<compile_context>
chip_gen: v7x
topology: tpu7x:2x2x1
jax: 0.10.0
libtpu: 0.0.40
codegen_flags: <defaults>
</compile_context>

<pallas_src>
import functools

import jax
import jax.numpy as jnp
from jax.experimental import pallas as pl
from jax.experimental.pallas import tpu as pltpu

LANES = 128
SUBLANES = 8
MAX_TILE_ROWS = 1024   # sweepable: 512 / 1024 / 2048 all fit VMEM comfortably


def _round_up(x, m):
    return ((x + m - 1) // m) * m


def _combo_partials_kernel(pred_ref, target_ref,
                           inter_ref, denom_ref, bce_ref,
                           *, steps, n_blocks, n_elems, tile_rows, needs_mask):
    c = pl.program_id(0)   # "parallel" chunk axis
    s = pl.program_id(1)   # "arbitrary" accumulation axis

    # Zero this chunk's resident accumulators on its first step.
    @pl.when(s == 0)
    def _():
        inter_ref[...] = jnp.zeros_like(inter_ref)
        denom_ref[...] = jnp.zeros_like(denom_ref)
        bce_ref[...] = jnp.zeros_like(bce_ref)

    x = pred_ref[...].astype(jnp.float32)
    y = target_ref[...].astype(jnp.float32)

    # Shared transcendentals: one exp + one log1p (+ one divide) per element.
    #   sigmoid(x) = 1/(1+e)  if x >= 0,  e/(1+e)  if x < 0,  with e = exp(-|x|)
    #   bce(x, y)  = max(x, 0) - x*y + log1p(e)   (PyTorch BCEWithLogits form)
    e = jnp.exp(-jnp.abs(x))
    r = 1.0 / (1.0 + e)
    p = jnp.where(x >= 0, r, e * r)
    bce = jnp.maximum(x, 0.0) - x * y + jnp.log1p(e)

    def _acc(inter_c, denom_c, bce_c):
        # Reduce the (tile_rows, 128) contribution to one (8, 128) vreg
        # (adds across sublane groups) and accumulate in place.
        inter_ref[0] += inter_c.reshape(-1, SUBLANES, LANES).sum(axis=0)
        denom_ref[0] += denom_c.reshape(-1, SUBLANES, LANES).sum(axis=0)
        bce_ref[0] += bce_c.reshape(-1, SUBLANES, LANES).sum(axis=0)

    if needs_mask:
        blk = c * steps + s
        # Global flat element index of each slot in this block
        # (fits int32: n_elems < 2**31 asserted in the wrapper).
        base = blk * (tile_rows * LANES)
        row_ids = jax.lax.broadcasted_iota(jnp.int32, (tile_rows, LANES), 0)
        lane_ids = jax.lax.broadcasted_iota(jnp.int32, (tile_rows, LANES), 1)
        valid = (base + row_ids * LANES + lane_ids) < n_elems

        @pl.when(blk < n_blocks - 1)
        def _():
            _acc(p * y, p + y, bce)

        @pl.when(blk >= n_blocks - 1)   # tail block and any filler repeats
        def _():
            zero = jnp.float32(0.0)
            _acc(jnp.where(valid, p * y, zero),
                 jnp.where(valid, p + y, zero),
                 jnp.where(valid, bce, zero))
    else:
        _acc(p * y, p + y, bce)


def combo_loss(pred, target, *, alpha=0.5, smooth=1e-6):
    """ComboLoss forward: alpha * DiceLoss(pred, target) + (1-alpha) * BCEWithLogits."""
    n_elems = int(pred.size)
    assert target.size == n_elems and n_elems > 0
    assert n_elems < 2 ** 31  # in-kernel indices are int32

    flat_pred = pred.reshape(-1)
    flat_target = target.reshape(-1)

    # Pad (only if necessary) to a multiple of the 128-lane width so the data
    # reshapes to a lane-dense (rows, 128) slab.  No dtype casting here.
    lane_pad = (-n_elems) % LANES
    if lane_pad:
        flat_pred = jnp.pad(flat_pred, (0, lane_pad))
        flat_target = jnp.pad(flat_target, (0, lane_pad))
    rows = (n_elems + lane_pad) // LANES

    tile_rows = min(MAX_TILE_ROWS, _round_up(rows, SUBLANES))
    n_blocks = pl.cdiv(rows, tile_rows)

    # Megacore chunking: prefer an exact divisor of n_blocks; for large,
    # non-divisible block counts accept a few fully-masked filler steps.
    n_chunks = 1
    for d in (8, 4, 2):
        if n_blocks % d == 0:
            n_chunks = d
            break
    if n_chunks == 1 and n_blocks >= 16:
        n_chunks = 8
    steps = pl.cdiv(n_blocks, n_chunks)

    needs_mask = (n_chunks * steps * tile_rows * LANES) != n_elems

    pred2d = flat_pred.reshape(rows, LANES)
    target2d = flat_target.reshape(rows, LANES)

    if n_chunks * steps == n_blocks:
        def row_map(c, s):
            return (c * steps + s, 0)
    else:
        last_blk = n_blocks - 1

        def row_map(c, s):
            # Clamp filler steps onto the last real block; their contribution
            # is fully masked out in-kernel.
            return (jnp.minimum(c * steps + s, last_blk), 0)

    kernel = functools.partial(
        _combo_partials_kernel,
        steps=steps, n_blocks=n_blocks, n_elems=n_elems,
        tile_rows=tile_rows, needs_mask=needs_mask)

    part_shape = jax.ShapeDtypeStruct((n_chunks, SUBLANES, LANES), jnp.float32)
    part_spec = pl.BlockSpec((1, SUBLANES, LANES), lambda c, s: (c, 0, 0))
    in_spec = pl.BlockSpec((tile_rows, LANES), row_map)

    inter_p, denom_p, bce_p = pl.pallas_call(
        kernel,
        out_shape=(part_shape, part_shape, part_shape),
        grid_spec=pltpu.PrefetchScalarGridSpec(
            num_scalar_prefetch=0,
            grid=(n_chunks, steps),
            in_specs=[in_spec, in_spec],
            out_specs=(part_spec, part_spec, part_spec),
        ),
        compiler_params=pltpu.CompilerParams(
            dimension_semantics=("parallel", "arbitrary")),
    )(pred2d, target2d)

    # Tiny final combine in the wrapper (3 * n_chunks * 1024 floats).
    inter = jnp.sum(inter_p)
    denom = jnp.sum(denom_p)
    bce_mean = jnp.sum(bce_p) / jnp.float32(n_elems)

    alpha = jnp.float32(alpha)
    smooth = jnp.float32(smooth)
    dice_loss = 1.0 - (2.0 * inter + smooth) / (denom + smooth)
    return alpha * dice_loss + (1.0 - alpha) * bce_mean


def _reference_combo_loss(pred, target, alpha=0.5, smooth=1e-6):
    """Pure-JAX reference mirroring the PyTorch module."""
    x = pred.reshape(-1).astype(jnp.float32)
    y = target.reshape(-1).astype(jnp.float32)
    p = jax.nn.sigmoid(x)
    inter = jnp.sum(p * y)
    dice = 1.0 - (2.0 * inter + smooth) / (jnp.sum(p) + jnp.sum(y) + smooth)
    bce = jnp.mean(jnp.maximum(x, 0.0) - x * y + jnp.log1p(jnp.exp(-jnp.abs(x))))
    return alpha * dice + (1.0 - alpha) * bce


if __name__ == "__main__":
    key = jax.random.PRNGKey(0)
    k1, k2 = jax.random.split(key)

    # Segmentation-style inputs: logits and binary targets, NCHW (B, C, H, W).
    pred = jax.random.normal(k1, (2, 4, 16, 16), dtype=jnp.float32)
    target = (jax.random.uniform(k2, (2, 4, 16, 16)) > 0.5).astype(jnp.float32)

    loss = combo_loss(pred, target, alpha=0.5, smooth=1e-6)
    loss = jax.block_until_ready(loss)

    ref = _reference_combo_loss(pred, target, alpha=0.5, smooth=1e-6)
    assert jnp.allclose(loss, ref, atol=1e-5, rtol=1e-5), (loss, ref)

    print("KERNEL_OK")
</pallas_src>

<mosaic_0001>
module attributes {stable_mosaic.version = 11 : i64} {
  func.func @_combo_partials_kernel(%arg0: i32, %arg1: i32, %arg2: memref<16x128xf32, #tpu.memory_space<vmem>>, %arg3: memref<16x128xf32, #tpu.memory_space<vmem>>, %arg4: memref<1x8x128xf32, #tpu.memory_space<vmem>>, %arg5: memref<1x8x128xf32, #tpu.memory_space<vmem>>, %arg6: memref<1x8x128xf32, #tpu.memory_space<vmem>>) attributes {dimension_semantics = [#tpu.dimension_semantics<parallel>, #tpu.dimension_semantics<arbitrary>], iteration_bounds = array<i64: 1, 1>, scalar_prefetch = 0 : i64, scratch_operands = 0 : i64, tpu.core_type = #tpu.core_type<tc>, window_params = [{transform_indices = @transform_0, window_bounds = array<i64: 16, 128>}, {transform_indices = @transform_1, window_bounds = array<i64: 16, 128>}, {transform_indices = @transform_2, window_bounds = array<i64: 1, 8, 128>}, {transform_indices = @transform_3, window_bounds = array<i64: 1, 8, 128>}, {transform_indices = @transform_4, window_bounds = array<i64: 1, 8, 128>}]} {
    %c0_i32 = arith.constant 0 : i32
    %0 = arith.cmpi eq, %arg1, %c0_i32 : i32
    %1 = arith.extui %0 : i1 to i32
    %c0_i32_0 = arith.constant 0 : i32
    %2 = arith.cmpi ne, %1, %c0_i32_0 : i32
    scf.if %2 {
      %cst_29 = arith.constant 0.000000e+00 : f32
      %49 = vector.broadcast %cst_29 : f32 to vector<1x8x128xf32>
      %c0_30 = arith.constant 0 : index
      %c0_31 = arith.constant 0 : index
      %c0_32 = arith.constant 0 : index
      %50 = vector.load %arg4[%c0_30, %c0_31, %c0_32] : memref<1x8x128xf32, #tpu.memory_space<vmem>>, vector<1x8x128xf32>
      tpu.vector_store %arg4[%c0_30, %c0_31, %c0_32], %49 {strides = array<i32>} : memref<1x8x128xf32, #tpu.memory_space<vmem>>, vector<1x8x128xf32>,
      %cst_33 = arith.constant 0.000000e+00 : f32
      %51 = vector.broadcast %cst_33 : f32 to vector<1x8x128xf32>
      %c0_34 = arith.constant 0 : index
      %c0_35 = arith.constant 0 : index
      %c0_36 = arith.constant 0 : index
      %52 = vector.load %arg5[%c0_34, %c0_35, %c0_36] : memref<1x8x128xf32, #tpu.memory_space<vmem>>, vector<1x8x128xf32>
      tpu.vector_store %arg5[%c0_34, %c0_35, %c0_36], %51 {strides = array<i32>} : memref<1x8x128xf32, #tpu.memory_space<vmem>>, vector<1x8x128xf32>,
      %cst_37 = arith.constant 0.000000e+00 : f32
      %53 = vector.broadcast %cst_37 : f32 to vector<1x8x128xf32>
      %c0_38 = arith.constant 0 : index
      %c0_39 = arith.constant 0 : index
      %c0_40 = arith.constant 0 : index
      %54 = vector.load %arg6[%c0_38, %c0_39, %c0_40] : memref<1x8x128xf32, #tpu.memory_space<vmem>>, vector<1x8x128xf32>
      tpu.vector_store %arg6[%c0_38, %c0_39, %c0_40], %53 {strides = array<i32>} : memref<1x8x128xf32, #tpu.memory_space<vmem>>, vector<1x8x128xf32>,
    } else {
    }
    %c0 = arith.constant 0 : index
    %c0_1 = arith.constant 0 : index
    %3 = vector.load %arg2[%c0, %c0_1] : memref<16x128xf32, #tpu.memory_space<vmem>>, vector<16x128xf32>
    %c0_2 = arith.constant 0 : index
    %c0_3 = arith.constant 0 : index
    %4 = vector.load %arg3[%c0_2, %c0_3] : memref<16x128xf32, #tpu.memory_space<vmem>>, vector<16x128xf32>
    %5 = math.absf %3 : vector<16x128xf32>
    %cst = arith.constant 0.000000e+00 : f32
    %6 = vector.broadcast %cst : f32 to vector<16x128xf32>
    %7 = arith.subf %6, %5 : vector<16x128xf32>
    %8 = math.exp %7 : vector<16x128xf32>
    %cst_4 = arith.constant 1.000000e+00 : f32
    %9 = vector.broadcast %cst_4 : f32 to vector<16x128xf32>
    %10 = arith.addf %9, %8 : vector<16x128xf32>
    %cst_5 = arith.constant 1.000000e+00 : f32
    %11 = vector.broadcast %cst_5 : f32 to vector<16x128xf32>
    %12 = arith.divf %11, %10 : vector<16x128xf32>
    %cst_6 = arith.constant 0.000000e+00 : f32
    %13 = vector.broadcast %cst_6 : f32 to vector<16x128xf32>
    %14 = arith.cmpf oge, %3, %13 : vector<16x128xf32>
    %15 = arith.mulf %8, %12 : vector<16x128xf32>
    %16 = arith.select %14, %12, %15 : vector<16x128xi1>, vector<16x128xf32>
    %cst_7 = arith.constant 0.000000e+00 : f32
    %17 = vector.broadcast %cst_7 : f32 to vector<16x128xf32>
    %18 = arith.maximumf %3, %17 : vector<16x128xf32>
    %19 = arith.mulf %3, %4 : vector<16x128xf32>
    %20 = arith.subf %18, %19 : vector<16x128xf32>
    %21 = math.log1p %8 : vector<16x128xf32>
    %22 = arith.addf %20, %21 : vector<16x128xf32>
    %23 = arith.mulf %16, %4 : vector<16x128xf32>
    %24 = arith.addf %16, %4 : vector<16x128xf32>
    %c0_8 = arith.constant 0 : index
    %c0_9 = arith.constant 0 : index
    %c0_10 = arith.constant 0 : index
    %25 = vector.load %arg4[%c0_8, %c0_9, %c0_10] : memref<1x8x128xf32, #tpu.memory_space<vmem>>, vector<1x8x128xf32>
    %26 = vector.shape_cast %25 : vector<1x8x128xf32> to vector<8x128xf32>
    %27 = vector.shape_cast %23 : vector<16x128xf32> to vector<2x8x128xf32>
    %cst_11 = arith.constant dense<0.000000e+00> : vector<8x128xf32>
    %28 = vector.multi_reduction <add>, %27, %cst_11 [0] : vector<2x8x128xf32> to vector<8x128xf32>
    %29 = arith.addf %26, %28 : vector<8x128xf32>
    %c0_12 = arith.constant 0 : index
    %c0_13 = arith.constant 0 : index
    %c0_14 = arith.constant 0 : index
    %30 = vector.load %arg4[%c0_12, %c0_13, %c0_14] : memref<1x8x128xf32, #tpu.memory_space<vmem>>, vector<1x8x128xf32>
    %31 = vector.shape_cast %30 : vector<1x8x128xf32> to vector<8x128xf32>
    %32 = vector.shape_cast %29 : vector<8x128xf32> to vector<1x8x128xf32>
    tpu.vector_store %arg4[%c0_12, %c0_13, %c0_14], %32 {strides = array<i32>} : memref<1x8x128xf32, #tpu.memory_space<vmem>>, vector<1x8x128xf32>,
    %c0_15 = arith.constant 0 : index
    %c0_16 = arith.constant 0 : index
    %c0_17 = arith.constant 0 : index
    %33 = vector.load %arg5[%c0_15, %c0_16, %c0_17] : memref<1x8x128xf32, #tpu.memory_space<vmem>>, vector<1x8x128xf32>
    %34 = vector.shape_cast %33 : vector<1x8x128xf32> to vector<8x128xf32>
    %35 = vector.shape_cast %24 : vector<16x128xf32> to vector<2x8x128xf32>
    %cst_18 = arith.constant dense<0.000000e+00> : vector<8x128xf32>
    %36 = vector.multi_reduction <add>, %35, %cst_18 [0] : vector<2x8x128xf32> to vector<8x128xf32>
    %37 = arith.addf %34, %36 : vector<8x128xf32>
    %c0_19 = arith.constant 0 : index
    %c0_20 = arith.constant 0 : index
    %c0_21 = arith.constant 0 : index
    %38 = vector.load %arg5[%c0_19, %c0_20, %c0_21] : memref<1x8x128xf32, #tpu.memory_space<vmem>>, vector<1x8x128xf32>
    %39 = vector.shape_cast %38 : vector<1x8x128xf32> to vector<8x128xf32>
    %40 = vector.shape_cast %37 : vector<8x128xf32> to vector<1x8x128xf32>
    tpu.vector_store %arg5[%c0_19, %c0_20, %c0_21], %40 {strides = array<i32>} : memref<1x8x128xf32, #tpu.memory_space<vmem>>, vector<1x8x128xf32>,
    %c0_22 = arith.constant 0 : index
    %c0_23 = arith.constant 0 : index
    %c0_24 = arith.constant 0 : index
    %41 = vector.load %arg6[%c0_22, %c0_23, %c0_24] : memref<1x8x128xf32, #tpu.memory_space<vmem>>, vector<1x8x128xf32>
    %42 = vector.shape_cast %41 : vector<1x8x128xf32> to vector<8x128xf32>
    %43 = vector.shape_cast %22 : vector<16x128xf32> to vector<2x8x128xf32>
    %cst_25 = arith.constant dense<0.000000e+00> : vector<8x128xf32>
    %44 = vector.multi_reduction <add>, %43, %cst_25 [0] : vector<2x8x128xf32> to vector<8x128xf32>
    %45 = arith.addf %42, %44 : vector<8x128xf32>
    %c0_26 = arith.constant 0 : index
    %c0_27 = arith.constant 0 : index
    %c0_28 = arith.constant 0 : index
    %46 = vector.load %arg6[%c0_26, %c0_27, %c0_28] : memref<1x8x128xf32, #tpu.memory_space<vmem>>, vector<1x8x128xf32>
    %47 = vector.shape_cast %46 : vector<1x8x128xf32> to vector<8x128xf32>
    %48 = vector.shape_cast %45 : vector<8x128xf32> to vector<1x8x128xf32>
    tpu.vector_store %arg6[%c0_26, %c0_27, %c0_28], %48 {strides = array<i32>} : memref<1x8x128xf32, #tpu.memory_space<vmem>>, vector<1x8x128xf32>,
    return
  }
  func.func @transform_0(%arg0: i32, %arg1: i32) -> (i32, i32) {
    %c1_i32 = arith.constant 1 : i32
    %0 = arith.muli %arg0, %c1_i32 : i32
    %1 = arith.addi %0, %arg1 : i32
    %c0_i32 = arith.constant 0 : i32
    %c0_i32_0 = arith.constant 0 : i32
    return %1, %c0_i32 : i32, i32
  }
  func.func @transform_1(%arg0: i32, %arg1: i32) -> (i32, i32) {
    %c1_i32 = arith.constant 1 : i32
    %0 = arith.muli %arg0, %c1_i32 : i32
    %1 = arith.addi %0, %arg1 : i32
    %c0_i32 = arith.constant 0 : i32
    %c0_i32_0 = arith.constant 0 : i32
    return %1, %c0_i32 : i32, i32
  }
  func.func @transform_2(%arg0: i32, %arg1: i32) -> (i32, i32, i32) {
    %c0_i32 = arith.constant 0 : i32
    %c0_i32_0 = arith.constant 0 : i32
    %c0_i32_1 = arith.constant 0 : i32
    return %arg0, %c0_i32, %c0_i32_0 : i32, i32, i32
  }
  func.func @transform_3(%arg0: i32, %arg1: i32) -> (i32, i32, i32) {
    %c0_i32 = arith.constant 0 : i32
    %c0_i32_0 = arith.constant 0 : i32
    %c0_i32_1 = arith.constant 0 : i32
    return %arg0, %c0_i32, %c0_i32_0 : i32, i32, i32
  }
  func.func @transform_4(%arg0: i32, %arg1: i32) -> (i32, i32, i32) {
    %c0_i32 = arith.constant 0 : i32
    %c0_i32_0 = arith.constant 0 : i32
    %c0_i32_1 = arith.constant 0 : i32
    return %arg0, %c0_i32, %c0_i32_0 : i32, i32, i32
  }
}

</mosaic_0001>

<bundles_post_ra>
// kernel: tpu_custom_call.1
= control target key start
LH: loop header
LB: loop body
LE: loop exit
PB: predicated region body
PF: predicated region fallthrough
CT: control target
= control target key end

     0   :  { %10 = vsyncpa [#allocation3], 0  ;;  %s416_s0 = inlined_call_operand.hbm [shape: f32[16,128], index: 0, kind: input, shape index: {}]   ;;  %s417_s1 = inlined_call_operand.hbm [shape: f32[16,128], index: 1, kind: input, shape index: {}]   ;;  %s418_s2 = inlined_call_operand.hbm [shape: f32[1,8,128], index: 2, kind: output, shape index: {0}]   ;;  %s419_s3 = inlined_call_operand.hbm [shape: f32[1,8,128], index: 3, kind: output, shape index: {1}]   ;;  %s420_s4 = inlined_call_operand.hbm [shape: f32[1,8,128], index: 4, kind: output, shape index: {2}]  }
   0x1   :  { %11 = vsyncpa [#allocation6], 0 }
   0x2   :  { %12 = vsyncpa [#allocation4], 0 }
   0x3   :  { %13 = vsyncpa [#allocation9], 0  ;;  %s310_s15 = smov [#allocation2]   ;;  %s192_s19 = scalar_lea.hbm %s416_s0, 256 }
   0x4   :  { %s23_s16 = sshll.u32 %s310_s15, 4  ;;  %p193_p0 = scmp.ne.s32.totalorder %s416_s0, %s192_s19  ;;  %s24_s16 = int_to_ptr.vmem [resolvable:$true] %s23_s16 }
   0x5   :  { %p196_p1 = scmp.lt.u32.totalorder %s192_s19, %s416_s0 }
   0x7   :  { %p198_p2 = pnand %p196_p1, %p193_p0 }
   0x9   :  { %201 = shalt.err (!%p198_p2)
}
   0xa   :  { %s202_s24 = scalar_lea.vmem %s24_s16, 256  ;;  %p207_p4 = scmp.lt.s32.totalorder %s24_s16, %s24_s16 }
   0xb   :  { %p203_p3 = scmp.ne.s32.totalorder %s24_s16, %s202_s24  ;;  %p208_p5 = scmp.lt.s32.totalorder %s202_s24, %s202_s24 }
   0xd   :  { %p209_p6 = por %p208_p5, %p207_p4 }
   0xf   :  { %p210_p7 = pnand %p209_p6, %p203_p3 }
  0x11   :  { %213 = shalt.err (!%p210_p7)
}
  0x12   :  { %s311_s25 = smov 128   ;;  %s312_s26 = smov 8  }
  0x13   :  { %29 = dma.hbm_to_vmem [thread:$0]  %s416_s0, 256, %s24_s16, [#allocation3], %s311_s25, %s311_s25, %s312_s26  }
  0x14   :  { %s313_s29 = smov [#allocation5]   ;;  %s214_s7 = scalar_lea.hbm %s417_s1, 256 }
  0x15   :  { %s39_s30 = sshll.u32 %s313_s29, 4  ;;  %p215_p8 = scmp.ne.s32.totalorder %s417_s1, %s214_s7  ;;  %s40_s30 = int_to_ptr.vmem [resolvable:$true] %s39_s30 }
  0x16   :  { %p218_p9 = scmp.lt.u32.totalorder %s214_s7, %s417_s1 }
  0x18   :  { %p220_p10 = pnand %p218_p9, %p215_p8 }
  0x1a   :  { %223 = shalt.err (!%p220_p10)
}
  0x1b   :  { %s224_s12 = scalar_lea.vmem %s40_s30, 256  ;;  %p229_p12 = scmp.lt.s32.totalorder %s40_s30, %s40_s30 }
  0x1c   :  { %p225_p11 = scmp.ne.s32.totalorder %s40_s30, %s224_s12  ;;  %p230_p13 = scmp.lt.s32.totalorder %s224_s12, %s224_s12 }
  0x1e   :  { %p231_p0 = por %p230_p13, %p229_p12 }
  0x20   :  { %p232_p1 = pnand %p231_p0, %p225_p11 }
  0x22   :  { %235 = shalt.err (!%p232_p1)
}
  0x23   :  { %45 = dma.hbm_to_vmem [thread:$0]  %s417_s1, 256, %s40_s30, [#allocation6], %s311_s25, %s311_s25, %s312_s26  }
  0x24   :  { %302 = dma.done.wait [#allocation3], 256  }
  0x25   :  { %303 = vsyncadd [#allocation3], 4294967040 }
  0x26   :  { %304 = dma.done.wait [#allocation6], 256  }
  0x27   :  { %305 = vsyncadd [#allocation6], 4294967040  ;;  %v63_v0 = vld [vmem:[#allocation2] sm:$0xff]  ;;  %v64_v1 = vld [vmem:[#allocation2 + $0x8] sm:$0xff]  ;;  %s314_s1 = smov [#allocation8]   ;;  %s315_s15 = smov [#allocation7]  }
  0x28   :  { %v67_v2 = vand.u32 2147483647, %v63_v0  ;;  %v68_v3 = vand.u32 2147483647, %v64_v1  ;;  %v65_v14 = vld [vmem:[#allocation5] sm:$0xff]  ;;  %v66_v15 = vld [vmem:[#allocation5 + $0x8] sm:$0xff] }
  0x29   :  { %v87_v17 = vmax.f32 %v63_v0, 0.0  ;;  %v89_v18 = vmul.f32 %v65_v14, %v63_v0  ;;  %v88_v21 = vmax.f32 %v64_v1, 0.0  ;;  %v90_v22 = vmul.f32 %v66_v15, %v64_v1  ;;  %s145_s14 = sshll.u32 %s314_s1, 4  ;;  %s135_s16 = sshll.u32 %s315_s15, 4  ;;  %s146_s14 = int_to_ptr.vmem [resolvable:$true] %s145_s14  ;;  %s366_s16 = int_to_ptr.vmem [resolvable:$true] %s135_s16 }
  0x2a   :  { %v69_v4 = vsub.f32 0.0, %v67_v2  ;;  %v70_v5 = vsub.f32 0.0, %v68_v3  ;;  %vm81_vm0 = vcmp.ge.f32.partialorder %v63_v0, 0.0  ;;  %vm82_vm1 = vcmp.ge.f32.partialorder %v64_v1, 0.0  ;;  %s316_s17 = smov [#allocation10]   ;;  %s236_s19 = scalar_lea.vmem %s146_s14, 128 }
  0x2b   :  { %v91_v30 = vsub.f32 %v87_v17, %v89_v18  ;;  %v92_v34 = vsub.f32 %v88_v21, %v90_v22  ;;  %s155_s18 = sshll.u32 %s316_s17, 4  ;;  %p237_p2 = scmp.ne.s32.totalorder %s146_s14, %s236_s19  ;;  %s368_s18 = int_to_ptr.vmem [resolvable:$true] %s155_s18 }
  0x2c   :  { %v71_v6 = vmul.f32 1.442695, %v69_v4  ;;  %v73_v7 = vmul.f32 1.442695, %v70_v5  ;;  %p241_p3 = scmp.lt.s32.totalorder %s146_s14, %s146_s14  ;;  %p242_p4 = scmp.lt.s32.totalorder %s236_s19, %s236_s19 }
  0x2e   :  { %180 = vpow2.f32 %v71_v6  ;;  %p243_p5 = por %p242_p4, %p241_p3 }
  0x2f   :  { %182 = vpow2.f32 %v73_v7 }
  0x30   :  { %p244_p6 = pnand %p243_p5, %p237_p2 }
  0x38   :  { %v181_v8 = vpop.eup %180 }
  0x39   :  { %v183_v9 = vpop.eup %182  ;;  %v75_v10 = vadd.f32 1.0, %v181_v8  ;;  %v96_v12 = vmul.f32 -0.5, %v181_v8  ;;  %v99_v19 = vand.u32 2147483647, %v181_v8 }
  0x3a   :  { %v76_v11 = vadd.f32 1.0, %v183_v9  ;;  %v105_v13 = vmul.f32 -0.5, %v183_v9  ;;  %v108_v23 = vand.u32 2147483647, %v183_v9 }
  0x3b   :  { %184 = vrcp.f32 %v75_v10  ;;  %v97_v16 = vadd.f32 1.0, %v96_v12  ;;  %vm100_vm2 = vcmp.lt.f32.partialorder %v99_v19, 0.0004427343 }
  0x3c   :  { %186 = vrcp.f32 %v76_v11  ;;  %v106_v20 = vadd.f32 1.0, %v105_v13  ;;  %vm109_vm3 = vcmp.lt.f32.partialorder %v108_v23, 0.0004427343 }
  0x3d   :  { %188 = vlog2.f32 %v75_v10  ;;  %v98_v27 = vmul.f32 %v181_v8, %v97_v16 }
  0x3e   :  { %190 = vlog2.f32 %v76_v11  ;;  %v107_v31 = vmul.f32 %v183_v9, %v106_v20 }
  0x45   :  { %v185_v24 = vpop.eup %184 }
  0x46   :  { %v187_v25 = vpop.eup %186  ;;  %v83_v26 = vmul.f32 %v185_v24, %v181_v8 }
  0x47   :  { %v189_v28 = vpop.eup %188  ;;  %v84_v29 = vmul.f32 %v187_v25, %v183_v9 }
  0x48   :  { %v191_v32 = vpop.eup %190  ;;  %v85_v33 = vsel %vm81_vm0, %v185_v24, %v83_v26  ;;  %v95_v35 = vmul.f32 0.6931472, %v189_v28 }
  0x49   :  { %v86_v36 = vsel %vm82_vm1, %v187_v25, %v84_v29  ;;  %v115_v37 = vadd.f32 %v85_v33, %v65_v14  ;;  %v113_v38 = vmul.f32 %v85_v33, %v65_v14  ;;  %v104_v39 = vmul.f32 0.6931472, %v191_v32 }
  0x4a   :  { %v116_v40 = vadd.f32 %v86_v36, %v66_v15  ;;  %v114_v41 = vmul.f32 %v86_v36, %v66_v15  ;;  %v101_v42 = vsel %vm100_vm2, %v98_v27, %v95_v35 }
  0x4b   :  { %v110_v43 = vsel %vm109_vm3, %v107_v31, %v104_v39  ;;  %v111_v44 = vadd.f32 %v101_v42, %v91_v30 }
  0x4c   :  { %v122_v45 = vadd.f32 %v116_v40, %v115_v37  ;;  %v118_v46 = vadd.f32 %v114_v41, %v113_v38  ;;  %v112_v47 = vadd.f32 %v110_v43, %v92_v34 }
  0x4e   :  { %v126_v48 = vadd.f32 %v112_v47, %v111_v44  ;;  %124 = vst [vmem:[#allocation8] sm:$0xff] %v122_v45  ;;  %120 = vst [vmem:[#allocation7] sm:$0xff] %v118_v46 }
  0x4f   :  { %247 = shalt.err (!%p244_p6)
}
  0x50   :  { %s248_s22 = scalar_lea.hbm %s419_s3, 128 }
  0x51   :  { %p249_p7 = scmp.ne.s32.totalorder %s419_s3, %s248_s22  ;;  %p252_p8 = scmp.lt.u32.totalorder %s248_s22, %s419_s3 }
  0x53   :  { %p254_p9 = pnand %p252_p8, %p249_p7 }
  0x55   :  { %257 = shalt.err (!%p254_p9)
}
  0x56   :  { %148 = dma.vmem_to_hbm [thread:$0]  %s146_s14, 128, %s419_s3, [#allocation9]   ;;  %128 = vst [vmem:[#allocation10] sm:$0xff] %v126_v48 }
  0x57   :  { %s258_s29 = scalar_lea.vmem %s366_s16, 128  ;;  %p263_p11 = scmp.lt.s32.totalorder %s366_s16, %s366_s16 }
  0x58   :  { %p259_p10 = scmp.ne.s32.totalorder %s366_s16, %s258_s29  ;;  %p264_p12 = scmp.lt.s32.totalorder %s258_s29, %s258_s29 }
  0x5a   :  { %p265_p13 = por %p264_p12, %p263_p11 }
  0x5c   :  { %p266_p0 = pnand %p265_p13, %p259_p10 }
  0x5e   :  { %269 = shalt.err (!%p266_p0)
}
  0x5f   :  { %s270_s6 = scalar_lea.hbm %s418_s2, 128 }
  0x60   :  { %p271_p1 = scmp.ne.s32.totalorder %s418_s2, %s270_s6  ;;  %p274_p2 = scmp.lt.u32.totalorder %s270_s6, %s418_s2 }
  0x62   :  { %p276_p3 = pnand %p274_p2, %p271_p1 }
  0x64   :  { %279 = shalt.err (!%p276_p3)
}
  0x65   :  { %138 = dma.vmem_to_hbm [thread:$0]  %s366_s16, 128, %s418_s2, [#allocation4]  }
  0x66   :  { %s280_s12 = scalar_lea.vmem %s368_s18, 128  ;;  %p285_p5 = scmp.lt.s32.totalorder %s368_s18, %s368_s18 }
  0x67   :  { %p281_p4 = scmp.ne.s32.totalorder %s368_s18, %s280_s12  ;;  %p286_p6 = scmp.lt.s32.totalorder %s280_s12, %s280_s12 }
  0x69   :  { %p287_p7 = por %p286_p6, %p285_p5 }
  0x6b   :  { %p288_p8 = pnand %p287_p7, %p281_p4 }
  0x6d   :  { %291 = shalt.err (!%p288_p8)
}
  0x6e   :  { %s292_s1 = scalar_lea.hbm %s420_s4, 128 }
  0x6f   :  { %p293_p9 = scmp.ne.s32.totalorder %s420_s4, %s292_s1  ;;  %p296_p10 = scmp.lt.u32.totalorder %s292_s1, %s420_s4 }
  0x71   :  { %p298_p11 = pnand %p296_p10, %p293_p9 }
  0x73   :  { %301 = shalt.err (!%p298_p11)
}
  0x74   :  { %158 = dma.vmem_to_hbm [thread:$0]  %s368_s18, 128, %s420_s4, [#allocation9]  }
  0x75   :  { %306 = dma.done.wait [#allocation4], 128  }
  0x76   :  { %307 = vsyncadd [#allocation4], 4294967168 }
  0x77   :  { %308 = dma.done.wait [#allocation9], 256  }
  0x78   :  { %309 = vsyncadd [#allocation9], 4294967040 }
  0x79   :  { %168 = vsyncpa [#allocation3], 1 }
  0x7a   :  { %169 = vsyncpa [#allocation6], 1 }
  0x7b   :  { %170 = vsyncpa [#allocation4], 1 }
  0x7c   :  { %171 = vsyncpa [#allocation9], 1 }

</bundles_post_ra>
